<compile_context>
chip_gen: v5e
topology: v5e:2x2
jax: 0.10.0
libtpu: 0.0.40
codegen_flags: <defaults>
</compile_context>

<pallas_src>
import functools

import jax
import jax.numpy as jnp
from jax.experimental import pallas as pl
from jax.experimental.pallas import tpu as pltpu

_SUBLANE = 8    # batch tile must be a multiple of this


def _round_up(x, m):
    return ((x + m - 1) // m) * m


def _net_kernel(x_ref, w1_ref, b1_ref, w2_ref, b2_ref, o_ref):
    # fc1: (TB, F) @ (F, H) + (1, H), ReLU
    h = jnp.dot(x_ref[...], w1_ref[...], preferred_element_type=jnp.float32)
    h = jnp.maximum(h + b1_ref[...], 0.0)
    # out: (TB, H) @ (H, A) + (1, A)  -- stored at true width A (masked vst)
    y = jnp.dot(h, w2_ref[...], preferred_element_type=jnp.float32)
    o_ref[...] = (y + b2_ref[...]).astype(o_ref.dtype)


def prepare_params(w1, b1, w2, b2):
    """One-time parameter prep (hoisted out of the per-call path).

    w1 : (H, F)  PyTorch-layout fc1.weight      b1 : (H,)
    w2 : (A, H)  PyTorch-layout out.weight      b2 : (A,)

    Returns kernel-ready arrays: w1_t (F, H), b1_2d (1, H), w2_t (H, A),
    b2_2d (1, A).  No lane padding: the output is written at its true width.
    """
    H, F = w1.shape
    A = w2.shape[0]
    w1_t = w1.T.astype(jnp.float32)                 # (F, H)
    b1_2d = b1.reshape(1, H).astype(jnp.float32)    # (1, H)
    w2_t = w2.T.astype(jnp.float32)                 # (H, A)
    b2_2d = b2.reshape(1, A).astype(jnp.float32)    # (1, A)
    return w1_t, b1_2d, w2_t, b2_2d


@functools.partial(jax.jit, static_argnames=("block_b",))
def _net_forward_impl(x, w1_t, b1_2d, w2_t, b2_2d, *, block_b):
    B, F = x.shape
    H = w1_t.shape[1]
    A = w2_t.shape[1]

    x = x.astype(jnp.float32)

    # Batch tile: multiple of 8, no larger than block_b, and capped at
    # ~ceil(B/2) so that whenever B > 8 the grid has >= 2 steps (lets the
    # "parallel" axis feed both v7x TensorCores; harmless on v5e/v6e).
    TB = min(block_b, _round_up(max((B + 1) // 2, 1), _SUBLANE))
    TB = max(_SUBLANE, _round_up(TB, _SUBLANE))

    grid = (pl.cdiv(B, TB),)   # ragged final block: output stores are masked

    cost = pl.CostEstimate(
        flops=2 * B * (F * H + H * A),
        transcendentals=0,
        bytes_accessed=4 * (B * F + B * A + F * H + H + H * A + A),
    )

    out = pl.pallas_call(
        _net_kernel,
        out_shape=jax.ShapeDtypeStruct((B, A), jnp.float32),
        grid=grid,
        in_specs=[
            # x: tiled along batch, double-buffered by Pallas.
            pl.BlockSpec((TB, F), lambda i: (i, 0)),
            # Weights / biases: constant block index -> stay VMEM-resident.
            pl.BlockSpec((F, H), lambda i: (0, 0)),
            pl.BlockSpec((1, H), lambda i: (0, 0)),
            pl.BlockSpec((H, A), lambda i: (0, 0)),
            pl.BlockSpec((1, A), lambda i: (0, 0)),
        ],
        out_specs=pl.BlockSpec((TB, A), lambda i: (i, 0)),
        compiler_params=pltpu.CompilerParams(
            dimension_semantics=("parallel",),   # v7x: shard batch over 2 TCs
        ),
        cost_estimate=cost,
    )(x, w1_t, b1_2d, w2_t, b2_2d)
    return out


def net_forward(x, params, *, block_b=1024):
    """Forward pass of Net.

    x      : (B, n_features) float32
    params : output of prepare_params(w1, b1, w2, b2)
    returns (B, n_actions) float32
    """
    w1_t, b1_2d, w2_t, b2_2d = params
    return _net_forward_impl(x, w1_t, b1_2d, w2_t, b2_2d, block_b=block_b)


def init_params(key, n_features, n_actions, hidden=20):
    """Matches the module's __init__: weights ~ N(0, 0.3); biases keep the
    default nn.Linear uniform init."""
    k1, k2, k3, k4 = jax.random.split(key, 4)
    w1 = 0.3 * jax.random.normal(k1, (hidden, n_features), dtype=jnp.float32)
    bound1 = 1.0 / jnp.sqrt(jnp.float32(n_features))
    b1 = jax.random.uniform(k2, (hidden,), minval=-bound1, maxval=bound1,
                            dtype=jnp.float32)
    w2 = 0.3 * jax.random.normal(k3, (n_actions, hidden), dtype=jnp.float32)
    bound2 = 1.0 / jnp.sqrt(jnp.float32(hidden))
    b2 = jax.random.uniform(k4, (n_actions,), minval=-bound2, maxval=bound2,
                            dtype=jnp.float32)
    return w1, b1, w2, b2


if __name__ == "__main__":
    key = jax.random.PRNGKey(0)
    kx, kp, kb = jax.random.split(key, 3)

    batch = 2
    n_features = 4   # CartPole-like observation dim
    n_actions = 3

    x = jax.random.normal(kx, (batch, n_features), dtype=jnp.float32)
    w1, b1, w2, b2 = init_params(kp, n_features, n_actions)
    params = prepare_params(w1, b1, w2, b2)

    # Small-batch path: single (ragged) grid step, masked output store.
    y = jax.block_until_ready(net_forward(x, params))
    h_ref = jnp.maximum(x @ w1.T + b1, 0.0)
    y_ref = h_ref @ w2.T + b2
    assert y.shape == (batch, n_actions)
    assert jnp.allclose(y, y_ref, atol=1e-5, rtol=1e-5)

    # Batched path: grid > 1 (>=2 steps so both v7x cores are used),
    # VMEM-resident weights, ragged final block (1000 rows, 504-row tiles).
    big_b = 1000
    xb = jax.random.normal(kb, (big_b, n_features), dtype=jnp.float32)
    yb = jax.block_until_ready(net_forward(xb, params))
    hb_ref = jnp.maximum(xb @ w1.T + b1, 0.0)
    yb_ref = hb_ref @ w2.T + b2
    assert yb.shape == (big_b, n_actions)
    assert jnp.allclose(yb, yb_ref, atol=1e-4, rtol=1e-4)

    print("KERNEL_OK")
</pallas_src>

<mosaic_0001>
module attributes {stable_mosaic.version = 11 : i64} {
  func.func @_net_kernel(%arg0: i32, %arg1: memref<8x4xf32, #tpu.memory_space<vmem>>, %arg2: memref<4x20xf32, #tpu.memory_space<vmem>>, %arg3: memref<1x20xf32, #tpu.memory_space<vmem>>, %arg4: memref<20x3xf32, #tpu.memory_space<vmem>>, %arg5: memref<1x3xf32, #tpu.memory_space<vmem>>, %arg6: memref<8x3xf32, #tpu.memory_space<vmem>>) attributes {dimension_semantics = [#tpu.dimension_semantics<parallel>], iteration_bounds = array<i64: 1>, scalar_prefetch = 0 : i64, scratch_operands = 0 : i64, tpu.core_type = #tpu.core_type<tc>, window_params = [{transform_indices = @transform_0, window_bounds = array<i64: 8, 4>}, {pipeline_mode = #tpu.pipeline_mode<synchronous>, transform_indices = @transform_1, window_bounds = array<i64: 4, 20>}, {pipeline_mode = #tpu.pipeline_mode<synchronous>, transform_indices = @transform_2, window_bounds = array<i64: 1, 20>}, {pipeline_mode = #tpu.pipeline_mode<synchronous>, transform_indices = @transform_3, window_bounds = array<i64: 20, 3>}, {pipeline_mode = #tpu.pipeline_mode<synchronous>, transform_indices = @transform_4, window_bounds = array<i64: 1, 3>}, {transform_indices = @transform_5, window_bounds = array<i64: 8, 3>}]} {
    %c0 = arith.constant 0 : index
    %c0_0 = arith.constant 0 : index
    %0 = vector.load %arg1[%c0, %c0_0] : memref<8x4xf32, #tpu.memory_space<vmem>>, vector<8x4xf32>
    %c0_1 = arith.constant 0 : index
    %c0_2 = arith.constant 0 : index
    %1 = vector.load %arg2[%c0_1, %c0_2] : memref<4x20xf32, #tpu.memory_space<vmem>>, vector<4x20xf32>
    %cst = arith.constant dense<0.000000e+00> : vector<8x20xf32>
    %2 = tpu.matmul %0, %1, %cst {dimension_numbers = #tpu.dot_dimension_numbers<[1], [0], [0], [1], [0, 0, 1, 1], [], []>} : vector<8x4xf32>, vector<4x20xf32>, vector<8x20xf32> -> vector<8x20xf32>
    %c0_3 = arith.constant 0 : index
    %c0_4 = arith.constant 0 : index
    %3 = vector.load %arg3[%c0_3, %c0_4] : memref<1x20xf32, #tpu.memory_space<vmem>>, vector<1x20xf32>
    %4 = vector.broadcast %3 : vector<1x20xf32> to vector<8x20xf32>
    %5 = arith.addf %2, %4 : vector<8x20xf32>
    %cst_5 = arith.constant 0.000000e+00 : f32
    %6 = vector.broadcast %cst_5 : f32 to vector<8x20xf32>
    %7 = arith.maximumf %5, %6 : vector<8x20xf32>
    %c0_6 = arith.constant 0 : index
    %c0_7 = arith.constant 0 : index
    %8 = vector.load %arg4[%c0_6, %c0_7] : memref<20x3xf32, #tpu.memory_space<vmem>>, vector<20x3xf32>
    %cst_8 = arith.constant dense<0.000000e+00> : vector<8x3xf32>
    %9 = tpu.matmul %7, %8, %cst_8 {dimension_numbers = #tpu.dot_dimension_numbers<[1], [0], [0], [1], [0, 0, 1, 1], [], []>} : vector<8x20xf32>, vector<20x3xf32>, vector<8x3xf32> -> vector<8x3xf32>
    %c0_9 = arith.constant 0 : index
    %c0_10 = arith.constant 0 : index
    %10 = vector.load %arg5[%c0_9, %c0_10] : memref<1x3xf32, #tpu.memory_space<vmem>>, vector<1x3xf32>
    %11 = vector.broadcast %10 : vector<1x3xf32> to vector<8x3xf32>
    %12 = arith.addf %9, %11 : vector<8x3xf32>
    %c0_11 = arith.constant 0 : index
    %c0_12 = arith.constant 0 : index
    %13 = vector.load %arg6[%c0_11, %c0_12] : memref<8x3xf32, #tpu.memory_space<vmem>>, vector<8x3xf32>
    tpu.vector_store %arg6[%c0_11, %c0_12], %12 {strides = array<i32>} : memref<8x3xf32, #tpu.memory_space<vmem>>, vector<8x3xf32>,
    return
  }
  func.func @transform_0(%arg0: i32) -> (i32, i32) {
    %c0_i32 = arith.constant 0 : i32
    %c0_i32_0 = arith.constant 0 : i32
    return %arg0, %c0_i32 : i32, i32
  }
  func.func @transform_1(%arg0: i32) -> (i32, i32) {
    %c0_i32 = arith.constant 0 : i32
    %c0_i32_0 = arith.constant 0 : i32
    %c0_i32_1 = arith.constant 0 : i32
    return %c0_i32, %c0_i32_0 : i32, i32
  }
  func.func @transform_2(%arg0: i32) -> (i32, i32) {
    %c0_i32 = arith.constant 0 : i32
    %c0_i32_0 = arith.constant 0 : i32
    %c0_i32_1 = arith.constant 0 : i32
    return %c0_i32, %c0_i32_0 : i32, i32
  }
  func.func @transform_3(%arg0: i32) -> (i32, i32) {
    %c0_i32 = arith.constant 0 : i32
    %c0_i32_0 = arith.constant 0 : i32
    %c0_i32_1 = arith.constant 0 : i32
    return %c0_i32, %c0_i32_0 : i32, i32
  }
  func.func @transform_4(%arg0: i32) -> (i32, i32) {
    %c0_i32 = arith.constant 0 : i32
    %c0_i32_0 = arith.constant 0 : i32
    %c0_i32_1 = arith.constant 0 : i32
    return %c0_i32, %c0_i32_0 : i32, i32
  }
  func.func @transform_5(%arg0: i32) -> (i32, i32) {
    %c0_i32 = arith.constant 0 : i32
    %c0_i32_0 = arith.constant 0 : i32
    return %arg0, %c0_i32 : i32, i32
  }
}

</mosaic_0001>

<bundles_post_ra>
// kernel: _net_forward_impl.1
= control target key start
LH: loop header
LB: loop body
LE: loop exit
PB: predicated region body
PF: predicated region fallthrough
CT: control target
= control target key end

     0   :  { %10 = vsyncpa [#allocation3], 0  ;;  %vm31_vm0 = vcmask 1043456   ;;  %vm27_vm1 = vcmask 31744   ;;  %vm63_vm2 = vcmask 162816   ;;  %vm90_vm3 = vcmask 23552   ;;  %s202_s0 = inlined_call_operand.vmem [shape: f32[2,4], index: 0, kind: input, shape index: {}]   ;;  %s203_s1 = inlined_call_operand.vmem [shape: f32[4,20], index: 1, kind: input, shape index: {}]   ;;  %s204_s2 = inlined_call_operand.vmem [shape: f32[1,20], index: 2, kind: input, shape index: {}]   ;;  %s205_s3 = inlined_call_operand.vmem [shape: f32[20,3], index: 3, kind: input, shape index: {}]   ;;  %s206_s4 = inlined_call_operand.vmem [shape: f32[1,3], index: 4, kind: input, shape index: {}]   ;;  %s207_s5 = inlined_call_operand.hbm [shape: f32[2,3], index: 5, kind: output, shape index: {}]  }
   0x1   :  { %v22_v0 = vld [vmem:[%s203_s1] sm:$0xf]  ;;  %v58_v2 = vld [vmem:[%s205_s3 + $0x10] sm:$0xf]  ;;  %v57_v3 = vld [vmem:[%s205_s3 + $0x8] sm:$0xff] }
   0x2   :  { %v21_v1 = vld [vmem:[%s202_s0] sm:$0xff]  ;;  %110 = vmatpush.msk.msra.mxu0 %vm31_vm0, %v22_v0  ;;  %112 = vmatpush.msk.msra.mxu1 %vm31_vm0, %v58_v2 }
   0x3   :  { %111 = vmatmul.msk.f32.vlgmr.msra.gmra.mxu0 %vm27_vm1, %v21_v1  ;;  %v56_v4 = vld [vmem:[%s205_s3] sm:$0xff] }
   0x4   :  { %84 = vmatpush.msra.mxu1 %v57_v3  ;;  %v117_v5 = vld [vmem:[%s204_s2] ss:$0 sm:$0xff] }
   0x5   :  { %v118_v9 = vld [vmem:[%s206_s4] ss:$0 sm:$0xff] }
   0x6   :  { %85 = vmatpush.msra.mxu1 %v56_v4 }
  0x80   :  { %v52_v6 = vpop.f32.mrf.mxu0 }
  0x81   :  { %v53_v7 = vadd.f32 %v117_v5, %v52_v6 }
  0x83   :  { %v55_v8 = vmax.f32 %v53_v7, 0.0 }
  0x85   :  { %113 = vmatmul.msk.f32.vlgmr.msra.gmra.mxu1 %vm63_vm2, %v55_v8 }
 0x102   :  { %v87_v10 = vpop.f32.mrf.mxu1 }
 0x103   :  { %v88_v11 = vadd.f32 %v118_v9, %v87_v10 }
 0x105   :  { %91 = vst.msk [vmem:[#allocation2] sm:$0xff] %vm90_vm3, %v88_v11 }
 0x106   :  { %95 = vsyncadd [#allocation3], 96  ;;  %s98_s6 = sshll.u32 %s207_s5, 4  ;;  %s145_s7 = smov [#allocation2]   ;;  %s99_s6 = int_to_ptr.hbm [resolvable:$true] %s98_s6 }
 0x107   :  { %s96_s2 = sshll.u32 %s145_s7, 4  ;;  %s146_s8 = smov 32   ;;  %s97_s2 = int_to_ptr.vmem [resolvable:$true] %s96_s2 }
 0x108   :  { %s147_s9 = smov 2  }
 0x109   :  { %104 = dma.vmem_to_hbm [thread:$0]  %s97_s2, 32, %s99_s6, [#allocation3], %s146_s8, %s146_s8, %s147_s9  }
 0x10a   :  { %143 = dma.done.wait [#allocation3], 128  }
 0x10b   :  { %144 = vsyncadd [#allocation3], 4294967168 }
 0x10c   :  { %109 = vsyncpa [#allocation3], 1 }

</bundles_post_ra>
